<compile_context>
chip_gen: v6e
topology: v6e:2x2x1
jax: 0.10.0
libtpu: 0.0.40
codegen_flags: <defaults>
</compile_context>

<pallas_src>
import functools

import jax
import jax.numpy as jnp
from jax.experimental import pallas as pl
from jax.experimental.pallas import tpu as pltpu

HIDDEN1 = 1024
HIDDEN2 = 256
OUT_DIM = 10           # true output width of fc3
OUT_PAD = 128          # lane-dense padded output width (zero columns 10..127)
LANE = 128
ROW_ALIGN = 16         # bf16 packs 2 rows per sublane -> keep row tiles 16-aligned
MIN_SPLIT_ROWS = 256   # batches with >= this many rows get >=2 grid steps (v7x dual-TC)
VMEM_LIMIT_BYTES = 32 * 1024 * 1024  # raise v5e's 16 MiB scoped default; < v7x 64 MiB phys


def _round_up(n, m):
    return (n + m - 1) // m * m


def _cdiv(a, b):
    return -(-a // b)


def _choose_tiling(batch, block_b):
    """Pick (batch tile, padded batch, grid steps).

    - tiles stay ROW_ALIGN-aligned (bf16 sublane packing),
    - an even number of >= 2 grid steps once the batch is big enough, so the
      "parallel" batch axis shards across both v7x TensorCores,
    - tile is shrunk to ceil(B/steps) so a batch just above a tile boundary
      does not pay nearly a full wasted tile of MXU work / writeback.
    """
    b_aligned = _round_up(batch, ROW_ALIGN)
    steps = max(1, _cdiv(b_aligned, block_b))
    if b_aligned >= MIN_SPLIT_ROWS:
        steps = max(steps, 2)
        if steps % 2:
            steps += 1
    eff_block = _round_up(_cdiv(b_aligned, steps), ROW_ALIGN)
    return eff_block, eff_block * steps, steps


def mlp_kernel(x_ref, w1_ref, b1_ref, w2_ref, b2_ref, w3_ref, b3_ref, o_ref):
    """Fused MLP forward for one batch tile.

    MXU: bf16 operands, f32 accumulation. VPU: bias add + ReLU in f32
    (v5e-safe). Weights/biases are VMEM-resident (constant index_maps).
    """
    x = x_ref[...]  # already bf16

    h1 = jnp.dot(x, w1_ref[...], preferred_element_type=jnp.float32) + b1_ref[...]
    h1 = jnp.maximum(h1, 0.0)

    h2 = jnp.dot(h1.astype(jnp.bfloat16), w2_ref[...],
                 preferred_element_type=jnp.float32) + b2_ref[...]
    h2 = jnp.maximum(h2, 0.0)

    h3 = jnp.dot(h2.astype(jnp.bfloat16), w3_ref[...],
                 preferred_element_type=jnp.float32) + b3_ref[...]
    o_ref[...] = h3.astype(o_ref.dtype)  # bf16, lane-dense 128-wide tile


@functools.partial(jax.jit, static_argnames=("block_b",))
def simple_net_forward(x, prepared_params, *, block_b=1024):
    """x: (B, input_dim) float32 -> (B, 10) float32.

    `prepared_params` must come from prepare_params(): bf16 weights (w3/b3
    zero-padded to OUT_PAD columns, w1 rows rounded to a multiple of 16),
    f32 biases.
    """
    assert block_b % ROW_ALIGN == 0, "block_b must be a multiple of 16"
    w1, b1, w2, b2, w3, b3 = prepared_params
    B, D = x.shape
    D_pad = w1.shape[0]
    assert D <= D_pad

    eff_block, B_pad, steps = _choose_tiling(B, block_b)

    # Cast activations to bf16 once in the wrapper (halves x HBM read + VMEM
    # double-buffer); pad only when needed (pad is an extra HBM copy).
    x_p = x.astype(jnp.bfloat16)
    if B_pad != B or D_pad != D:
        x_p = jnp.pad(x_p, ((0, B_pad - B), (0, D_pad - D)))

    grid = (steps,)

    # Batch is tiled over the grid; weights/biases use constant index_maps so
    # they stay resident in VMEM across grid steps.
    in_specs = [
        pl.BlockSpec((eff_block, D_pad), lambda i: (i, 0)),      # x tile (bf16)
        pl.BlockSpec((D_pad, HIDDEN1), lambda i: (0, 0)),        # w1 (bf16)
        pl.BlockSpec((1, HIDDEN1), lambda i: (0, 0)),            # b1 (f32)
        pl.BlockSpec((HIDDEN1, HIDDEN2), lambda i: (0, 0)),      # w2 (bf16)
        pl.BlockSpec((1, HIDDEN2), lambda i: (0, 0)),            # b2 (f32)
        pl.BlockSpec((HIDDEN2, OUT_PAD), lambda i: (0, 0)),      # w3 (bf16, padded)
        pl.BlockSpec((1, OUT_PAD), lambda i: (0, 0)),            # b3 (f32, padded)
    ]
    out_spec = pl.BlockSpec((eff_block, OUT_PAD), lambda i: (i, 0))

    # Advisory cost hint for XLA scheduling around the custom call.
    flops = 2 * B_pad * (D_pad * HIDDEN1 + HIDDEN1 * HIDDEN2 + HIDDEN2 * OUT_PAD)
    param_bytes = sum(int(p.size) * p.dtype.itemsize for p in (w1, b1, w2, b2, w3, b3))
    bytes_accessed = (int(x_p.size) * 2) + param_bytes + B_pad * OUT_PAD * 2
    cost = pl.CostEstimate(flops=flops, transcendentals=0, bytes_accessed=bytes_accessed)

    out = pl.pallas_call(
        mlp_kernel,
        out_shape=jax.ShapeDtypeStruct((B_pad, OUT_PAD), jnp.bfloat16),  # pinned dtype
        grid_spec=pltpu.PrefetchScalarGridSpec(
            num_scalar_prefetch=0,
            grid=grid,
            in_specs=in_specs,
            out_specs=out_spec,
        ),
        compiler_params=pltpu.CompilerParams(
            dimension_semantics=("parallel",),
            vmem_limit_bytes=VMEM_LIMIT_BYTES,
        ),
        cost_estimate=cost,
    )(x_p, w1, b1, w2, b2, w3, b3)

    # Slice off padded rows/columns and restore the module's f32 output dtype.
    return out[:B, :OUT_DIM].astype(jnp.float32)


def init_params(key, input_dim):
    """PyTorch nn.Linear-style init (U[-1/sqrt(fan_in), 1/sqrt(fan_in)]).

    Weights stored transposed vs. PyTorch ((in, out)) so the kernel computes
    x @ W directly; semantics identical. Returns f32.
    """
    def linear(k, fan_in, fan_out):
        kw, kb = jax.random.split(k)
        bound = 1.0 / jnp.sqrt(fan_in)
        w = jax.random.uniform(kw, (fan_in, fan_out), jnp.float32, -bound, bound)
        b = jax.random.uniform(kb, (1, fan_out), jnp.float32, -bound, bound)
        return w, b

    k1, k2, k3 = jax.random.split(key, 3)
    w1, b1 = linear(k1, input_dim, HIDDEN1)
    w2, b2 = linear(k2, HIDDEN1, HIDDEN2)
    w3, b3 = linear(k3, HIDDEN2, OUT_DIM)
    return (w1, b1, w2, b2, w3, b3)


def prepare_params(params, input_dim):
    """Cast weights to bf16 and pad to kernel-friendly shapes.

    - w1: pad contraction dim input_dim -> round_up(input_dim, 16) only
      (bf16 sublane multiple); no more padding to 128.
    - w3/b3: pad output dim 10 -> 128 (extra columns exactly zero; sliced off
      after the call). Biases stay f32.
    """
    w1, b1, w2, b2, w3, b3 = params
    d_pad = _round_up(input_dim, ROW_ALIGN)

    w1p = jnp.pad(w1.astype(jnp.bfloat16), ((0, d_pad - input_dim), (0, 0)))
    w2p = w2.astype(jnp.bfloat16)
    w3p = jnp.pad(w3.astype(jnp.bfloat16), ((0, 0), (0, OUT_PAD - OUT_DIM)))
    b3p = jnp.pad(b3, ((0, 0), (0, OUT_PAD - OUT_DIM)))
    return (w1p, b1, w2p, b2, w3p, b3p)


def reference_forward(x, params):
    """Pure-JAX reference mirroring the kernel's precision (bf16 MXU operands, f32 accum)."""
    w1, b1, w2, b2, w3, b3 = params
    bf = jnp.bfloat16
    h = jnp.maximum(
        jnp.dot(x.astype(bf), w1.astype(bf), preferred_element_type=jnp.float32) + b1, 0.0)
    h = jnp.maximum(
        jnp.dot(h.astype(bf), w2.astype(bf), preferred_element_type=jnp.float32) + b2, 0.0)
    return jnp.dot(h.astype(bf), w3.astype(bf), preferred_element_type=jnp.float32) + b3


if __name__ == "__main__":
    key = jax.random.PRNGKey(0)
    k_param, k_x = jax.random.split(key)

    batch = 8
    input_dim = 32

    params_f32 = init_params(k_param, input_dim)
    params = prepare_params(params_f32, input_dim)
    x = jax.random.normal(k_x, (batch, input_dim), jnp.float32)

    out = simple_net_forward(x, params)
    out = jax.block_until_ready(out)

    ref = reference_forward(x, params_f32)
    assert out.shape == (batch, OUT_DIM), out.shape
    # Kernel output goes through a final bf16 store; allow bf16-level tolerance.
    assert jnp.allclose(out, ref, atol=3e-2, rtol=2e-2), "mismatch vs reference"

    print("KERNEL_OK")
</pallas_src>

<mosaic_0001>
module attributes {stable_mosaic.version = 11 : i64} {
  func.func @mlp_kernel(%arg0: i32, %arg1: memref<16x32xbf16, #tpu.memory_space<vmem>>, %arg2: memref<32x1024xbf16, #tpu.memory_space<vmem>>, %arg3: memref<1x1024xf32, #tpu.memory_space<vmem>>, %arg4: memref<1024x256xbf16, #tpu.memory_space<vmem>>, %arg5: memref<1x256xf32, #tpu.memory_space<vmem>>, %arg6: memref<256x128xbf16, #tpu.memory_space<vmem>>, %arg7: memref<1x128xf32, #tpu.memory_space<vmem>>, %arg8: memref<16x128xbf16, #tpu.memory_space<vmem>>) attributes {dimension_semantics = [#tpu.dimension_semantics<parallel>], iteration_bounds = array<i64: 1>, scalar_prefetch = 0 : i64, scratch_operands = 0 : i64, tpu.core_type = #tpu.core_type<tc>, window_params = [{transform_indices = @transform_0, window_bounds = array<i64: 16, 32>}, {pipeline_mode = #tpu.pipeline_mode<synchronous>, transform_indices = @transform_1, window_bounds = array<i64: 32, 1024>}, {pipeline_mode = #tpu.pipeline_mode<synchronous>, transform_indices = @transform_2, window_bounds = array<i64: 1, 1024>}, {pipeline_mode = #tpu.pipeline_mode<synchronous>, transform_indices = @transform_3, window_bounds = array<i64: 1024, 256>}, {pipeline_mode = #tpu.pipeline_mode<synchronous>, transform_indices = @transform_4, window_bounds = array<i64: 1, 256>}, {pipeline_mode = #tpu.pipeline_mode<synchronous>, transform_indices = @transform_5, window_bounds = array<i64: 256, 128>}, {pipeline_mode = #tpu.pipeline_mode<synchronous>, transform_indices = @transform_6, window_bounds = array<i64: 1, 128>}, {transform_indices = @transform_7, window_bounds = array<i64: 16, 128>}]} {
    %c0 = arith.constant 0 : index
    %c0_0 = arith.constant 0 : index
    %0 = vector.load %arg1[%c0, %c0_0] : memref<16x32xbf16, #tpu.memory_space<vmem>>, vector<16x32xbf16>
    %c0_1 = arith.constant 0 : index
    %c0_2 = arith.constant 0 : index
    %1 = vector.load %arg2[%c0_1, %c0_2] : memref<32x1024xbf16, #tpu.memory_space<vmem>>, vector<32x1024xbf16>
    %cst = arith.constant dense<0.000000e+00> : vector<16x1024xf32>
    %2 = tpu.matmul %0, %1, %cst {dimension_numbers = #tpu.dot_dimension_numbers<[1], [0], [0], [1], [0, 0, 1, 1], [], []>} : vector<16x32xbf16>, vector<32x1024xbf16>, vector<16x1024xf32> -> vector<16x1024xf32>
    %c0_3 = arith.constant 0 : index
    %c0_4 = arith.constant 0 : index
    %3 = vector.load %arg3[%c0_3, %c0_4] : memref<1x1024xf32, #tpu.memory_space<vmem>>, vector<1x1024xf32>
    %4 = vector.broadcast %3 : vector<1x1024xf32> to vector<16x1024xf32>
    %5 = arith.addf %2, %4 : vector<16x1024xf32>
    %cst_5 = arith.constant 0.000000e+00 : f32
    %6 = vector.broadcast %cst_5 : f32 to vector<16x1024xf32>
    %7 = arith.maximumf %5, %6 : vector<16x1024xf32>
    %8 = arith.truncf %7 : vector<16x1024xf32> to vector<16x1024xbf16>
    %c0_6 = arith.constant 0 : index
    %c0_7 = arith.constant 0 : index
    %9 = vector.load %arg4[%c0_6, %c0_7] : memref<1024x256xbf16, #tpu.memory_space<vmem>>, vector<1024x256xbf16>
    %cst_8 = arith.constant dense<0.000000e+00> : vector<16x256xf32>
    %10 = tpu.matmul %8, %9, %cst_8 {dimension_numbers = #tpu.dot_dimension_numbers<[1], [0], [0], [1], [0, 0, 1, 1], [], []>} : vector<16x1024xbf16>, vector<1024x256xbf16>, vector<16x256xf32> -> vector<16x256xf32>
    %c0_9 = arith.constant 0 : index
    %c0_10 = arith.constant 0 : index
    %11 = vector.load %arg5[%c0_9, %c0_10] : memref<1x256xf32, #tpu.memory_space<vmem>>, vector<1x256xf32>
    %12 = vector.broadcast %11 : vector<1x256xf32> to vector<16x256xf32>
    %13 = arith.addf %10, %12 : vector<16x256xf32>
    %cst_11 = arith.constant 0.000000e+00 : f32
    %14 = vector.broadcast %cst_11 : f32 to vector<16x256xf32>
    %15 = arith.maximumf %13, %14 : vector<16x256xf32>
    %16 = arith.truncf %15 : vector<16x256xf32> to vector<16x256xbf16>
    %c0_12 = arith.constant 0 : index
    %c0_13 = arith.constant 0 : index
    %17 = vector.load %arg6[%c0_12, %c0_13] : memref<256x128xbf16, #tpu.memory_space<vmem>>, vector<256x128xbf16>
    %cst_14 = arith.constant dense<0.000000e+00> : vector<16x128xf32>
    %18 = tpu.matmul %16, %17, %cst_14 {dimension_numbers = #tpu.dot_dimension_numbers<[1], [0], [0], [1], [0, 0, 1, 1], [], []>} : vector<16x256xbf16>, vector<256x128xbf16>, vector<16x128xf32> -> vector<16x128xf32>
    %c0_15 = arith.constant 0 : index
    %c0_16 = arith.constant 0 : index
    %19 = vector.load %arg7[%c0_15, %c0_16] : memref<1x128xf32, #tpu.memory_space<vmem>>, vector<1x128xf32>
    %20 = vector.broadcast %19 : vector<1x128xf32> to vector<16x128xf32>
    %21 = arith.addf %18, %20 : vector<16x128xf32>
    %22 = arith.truncf %21 : vector<16x128xf32> to vector<16x128xbf16>
    %c0_17 = arith.constant 0 : index
    %c0_18 = arith.constant 0 : index
    %23 = vector.load %arg8[%c0_17, %c0_18] : memref<16x128xbf16, #tpu.memory_space<vmem>>, vector<16x128xbf16>
    tpu.vector_store %arg8[%c0_17, %c0_18], %22 {strides = array<i32>} : memref<16x128xbf16, #tpu.memory_space<vmem>>, vector<16x128xbf16>,
    return
  }
  func.func @transform_0(%arg0: i32) -> (i32, i32) {
    %c0_i32 = arith.constant 0 : i32
    %c0_i32_0 = arith.constant 0 : i32
    return %arg0, %c0_i32 : i32, i32
  }
  func.func @transform_1(%arg0: i32) -> (i32, i32) {
    %c0_i32 = arith.constant 0 : i32
    %c0_i32_0 = arith.constant 0 : i32
    %c0_i32_1 = arith.constant 0 : i32
    return %c0_i32, %c0_i32_0 : i32, i32
  }
  func.func @transform_2(%arg0: i32) -> (i32, i32) {
    %c0_i32 = arith.constant 0 : i32
    %c0_i32_0 = arith.constant 0 : i32
    %c0_i32_1 = arith.constant 0 : i32
    return %c0_i32, %c0_i32_0 : i32, i32
  }
  func.func @transform_3(%arg0: i32) -> (i32, i32) {
    %c0_i32 = arith.constant 0 : i32
    %c0_i32_0 = arith.constant 0 : i32
    %c0_i32_1 = arith.constant 0 : i32
    return %c0_i32, %c0_i32_0 : i32, i32
  }
  func.func @transform_4(%arg0: i32) -> (i32, i32) {
    %c0_i32 = arith.constant 0 : i32
    %c0_i32_0 = arith.constant 0 : i32
    %c0_i32_1 = arith.constant 0 : i32
    return %c0_i32, %c0_i32_0 : i32, i32
  }
  func.func @transform_5(%arg0: i32) -> (i32, i32) {
    %c0_i32 = arith.constant 0 : i32
    %c0_i32_0 = arith.constant 0 : i32
    %c0_i32_1 = arith.constant 0 : i32
    return %c0_i32, %c0_i32_0 : i32, i32
  }
  func.func @transform_6(%arg0: i32) -> (i32, i32) {
    %c0_i32 = arith.constant 0 : i32
    %c0_i32_0 = arith.constant 0 : i32
    %c0_i32_1 = arith.constant 0 : i32
    return %c0_i32, %c0_i32_0 : i32, i32
  }
  func.func @transform_7(%arg0: i32) -> (i32, i32) {
    %c0_i32 = arith.constant 0 : i32
    %c0_i32_0 = arith.constant 0 : i32
    return %arg0, %c0_i32 : i32, i32
  }
}

</mosaic_0001>

<bundles_post_ra>
// kernel: simple_net_forward.1
= control target key start
LH: loop header
LB: loop body
LE: loop exit
PB: predicated region body
PF: predicated region fallthrough
CT: control target
= control target key end

     0   :  { %12 = vsyncpa [#allocation3], 0  ;;  %s2171_s0 = inlined_call_operand.vmem [shape: bf16[16,32], index: 0, kind: input, shape index: {}]   ;;  %s2172_s1 = inlined_call_operand.hbm [shape: bf16[32,1024], index: 1, kind: input, shape index: {}]   ;;  %s2173_s2 = inlined_call_operand.vmem [shape: f32[1,1024], index: 2, kind: input, shape index: {}]   ;;  %s2174_s3 = inlined_call_operand.hbm [shape: bf16[1024,256], index: 3, kind: input, shape index: {}]   ;;  %s2175_s4 = inlined_call_operand.vmem [shape: f32[1,256], index: 4, kind: input, shape index: {}]   ;;  %s2176_s5 = inlined_call_operand.hbm [shape: bf16[256,128], index: 5, kind: input, shape index: {}]   ;;  %s2177_s6 = inlined_call_operand.vmem [shape: f32[1,128], index: 6, kind: input, shape index: {}]   ;;  %s2178_s7 = inlined_call_operand.vmem [shape: bf16[16,128], index: 7, kind: output, shape index: {}]  }
   0x1   :  { %13 = vsyncpa [#allocation5], 0  ;;  %s2043_s24 = smov [#allocation4]  }
   0x2   :  { %s35_s25 = sshll.u32 %s2043_s24, 4  ;;  %s36_s25 = int_to_ptr.vmem [resolvable:$true] %s35_s25 }
   0x3   :  { %s1987_s26 = scalar_lea.vmem %s36_s25, 16384  ;;  %p1992_p1 = scmp.lt.s32.totalorder %s36_s25, %s36_s25 }
   0x4   :  { %p1988_p0 = scmp.ne.s32.totalorder %s36_s25, %s1987_s26  ;;  %p1993_p2 = scmp.lt.s32.totalorder %s1987_s26, %s1987_s26 }
   0x6   :  { %p1994_p3 = por %p1993_p2, %p1992_p1 }
   0x8   :  { %p1995_p4 = pnand %p1994_p3, %p1988_p0 }
   0xa   :  { %1998 = shalt.err (!%p1995_p4)
}
   0xb   :  { %s2044_s27 = smov 128   ;;  %s2045_s28 = smov 8  }
   0xc   :  { %41 = dma.hbm_to_vmem [thread:$0]  %s2174_s3, 16384, %s36_s25, [#allocation5], %s2044_s27, %s2044_s27, %s2045_s28  }
   0xd   :  { %s2046_s8 = smov [#allocation2]  }
   0xe   :  { %s21_s9 = sshll.u32 %s2046_s8, 4  ;;  %s22_s9 = int_to_ptr.vmem [resolvable:$true] %s21_s9 }
   0xf   :  { %s2007_s10 = scalar_lea.vmem %s22_s9, 2048  ;;  %p2012_p6 = scmp.lt.s32.totalorder %s22_s9, %s22_s9 }
  0x10   :  { %p2008_p5 = scmp.ne.s32.totalorder %s22_s9, %s2007_s10  ;;  %p2013_p7 = scmp.lt.s32.totalorder %s2007_s10, %s2007_s10 }
  0x12   :  { %p2014_p8 = por %p2013_p7, %p2012_p6 }
  0x14   :  { %p2015_p9 = pnand %p2014_p8, %p2008_p5 }
  0x16   :  { %2018 = shalt.err (!%p2015_p9)
}
  0x17   :  { %s2047_s11 = smov 512   ;;  %s2048_s12 = smov 32  }
  0x18   :  { %27 = dma.hbm_to_vmem [thread:$0]  %s2172_s1, 2048, %s22_s9, [#allocation3], %s2047_s11, %s2047_s11, %s2048_s12  }
  0x19   :  { %s2049_s15 = smov [#allocation6]  }
  0x1a   :  { %s49_s16 = sshll.u32 %s2049_s15, 4  ;;  %s50_s16 = int_to_ptr.vmem [resolvable:$true] %s49_s16 }
  0x1b   :  { %s2027_s3 = scalar_lea.vmem %s50_s16, 2048  ;;  %p2032_p11 = scmp.lt.s32.totalorder %s50_s16, %s50_s16 }
  0x1c   :  { %p2028_p10 = scmp.ne.s32.totalorder %s50_s16, %s2027_s3  ;;  %p2033_p12 = scmp.lt.s32.totalorder %s2027_s3, %s2027_s3 }
  0x1e   :  { %p2034_p13 = por %p2033_p12, %p2032_p11 }
  0x20   :  { %p2035_p0 = pnand %p2034_p13, %p2028_p10 }
  0x22   :  { %2038 = shalt.err (!%p2035_p0)
}
  0x23   :  { %s2050_s17 = smov 64   ;;  %s2051_s18 = smov 4  }
  0x24   :  { %55 = dma.hbm_to_vmem [thread:$0]  %s2176_s5, 2048, %s50_s16, [#allocation5], %s2050_s17, %s2050_s17, %s2051_s18  }
  0x25   :  { %2039 = dma.done.wait [#allocation3], 2048  }
  0x26   :  { %2040 = vsyncadd [#allocation3], 4294965248 }
  0x27   :  { %2041 = dma.done.wait [#allocation5], 18432  }
  0x28   :  { %2042 = vsyncadd [#allocation5], 4294948864  ;;  %v2052_v0 = vmov 0   ;;  %v78_v1 = vld [vmem:[#allocation2 + $0x40] sm:$0xff]  ;;  %v79_v8 = vld [vmem:[#allocation2 + $0x48] sm:$0xff]  ;;  %vm213_vm0 = vcmask 261120  }
  0x29   :  { %249 = vmatprep.mubr.bf16.mxu1 %v2052_v0  ;;  %v82_v2 = vld [vmem:[#allocation2 + $0x60] sm:$0xff]  ;;  %v83_v9 = vld [vmem:[#allocation2 + $0x68] sm:$0xff]  ;;  %v1771_v15 = vld [vmem:[#allocation4 + $0x74] ss:$8 sps:$4 sm:$0xff]  }
  0x2a   :  { %v70_v3 = vld [vmem:[#allocation2] sm:$0xff]  ;;  %v1573_v4 = vcombine.high %v78_v1, %v82_v2  ;;  %v1572_v5 = vcombine.low %v78_v1, %v82_v2  ;;  %v1575_v12 = vcombine.high %v79_v8, %v83_v9  ;;  %v71_v13 = vld [vmem:[#allocation2 + $0x8] sm:$0xff]  ;;  %v1773_v16 = vld [vmem:[#allocation4 + $0x70] ss:$8 sps:$4 sm:$0xff]   ;;  %v1574_v17 = vcombine.low %v79_v8, %v83_v9  ;;  %1193 = vmatprep.subr.bf16.mxu0 %v1771_v15 }
  0x2b   :  { %v74_v6 = vld [vmem:[#allocation2 + $0x20] sm:$0xff]  ;;  %v75_v14 = vld [vmem:[#allocation2 + $0x28] sm:$0xff]  ;;  %v80_v18 = vld [vmem:[#allocation2 + $0x50] sm:$0xff]  ;;  %1194 = vmatpush1.bf16.msra.mxu0 %v1773_v16 }
  0x2c   :  { %v1565_v7 = vcombine.high %v70_v3, %v74_v6  ;;  %229 = vmatprep.subr.bf16.mxu1 %v1573_v4  ;;  %v1564_v10 = vcombine.low %v70_v3, %v74_v6  ;;  %v2106_v11 = vld [vmem:[%s2171_s0] sm:$0xff]   ;;  %v1567_v20 = vcombine.high %v71_v13, %v75_v14  ;;  %v84_v21 = vld [vmem:[#allocation2 + $0x70] sm:$0xff]  ;;  %v1566_v24 = vcombine.low %v71_v13, %v75_v14  ;;  %v81_v31 = vld [vmem:[#allocation2 + $0x58] sm:$0xff] }
  0x2d   :  { %230 = vmatpush1.bf16.msra.mxu1 %v1572_v5  ;;  %v1774_v19 = vld [vmem:[#allocation4 + $0x64] ss:$8 sps:$4 sm:$0xff]   ;;  %v1776_v22 = vld [vmem:[#allocation4 + $0x60] ss:$8 sps:$4 sm:$0xff]   ;;  %v1777_v23 = vld [vmem:[#allocation4 + $0x54] ss:$8 sps:$4 sm:$0xff]   ;;  %v1577_v25 = vcombine.high %v80_v18, %v84_v21  ;;  %v1576_v30 = vcombine.low %v80_v18, %v84_v21 }
  0x2e   :  { %231 = vmatprep.subr.bf16.mxu1 %v1565_v7  ;;  %1195 = vmatprep.subr.bf16.mxu0 %v1774_v19  ;;  %v72_v26 = vld [vmem:[#allocation2 + $0x10] sm:$0xff]  ;;  %v1783_v29 = vld [vmem:[#allocation4 + $0x44] ss:$8 sps:$4 sm:$0xff]   ;;  %v85_v33 = vld [vmem:[#allocation2 + $0x78] sm:$0xff] }
  0x2f   :  { %v76_v27 = vld [vmem:[#allocation2 + $0x30] sm:$0xff]  ;;  %1196 = vmatpush1.bf16.msra.mxu0 %v1776_v22  ;;  %v1788_v34 = vld [vmem:[#allocation4 + $0x40] ss:$8 sps:$4 sm:$0xff]   ;;  %v1579_v37 = vcombine.high %v81_v31, %v85_v33  ;;  %v73_v38 = vld [vmem:[#allocation2 + $0x18] sm:$0xff]  ;;  %v1578_v42 = vcombine.low %v81_v31, %v85_v33 }
  0x30   :  { %v1782_v28 = vld [vmem:[#allocation4 + $0x50] ss:$8 sps:$4 sm:$0xff]   ;;  %1197 = vmatprep.subr.bf16.mxu0 %v1777_v23  ;;  %v1569_v32 = vcombine.high %v72_v26, %v76_v27  ;;  %v1789_v35 = vld [vmem:[#allocation4 + $0x34] ss:$8 sps:$4 sm:$0xff]   ;;  %v1568_v36 = vcombine.low %v72_v26, %v76_v27  ;;  %v1795_v41 = vld [vmem:[#allocation4 + $0x24] ss:$8 sps:$4 sm:$0xff]  }
  0x31   :  { %232 = vmatpush1.bf16.msra.mxu1 %v1564_v10  ;;  %v77_v39 = vld [vmem:[#allocation2 + $0x38] sm:$0xff]  ;;  %v1800_v44 = vld [vmem:[#allocation4 + $0x20] ss:$8 sps:$4 sm:$0xff]   ;;  %v1807_v49 = vld [vmem:[#allocation4 + $0x4] ss:$8 sps:$4 sm:$0xff]  }
  0x32   :  { %272 = vmatprep.subr.bf16.mxu1 %v1575_v12  ;;  %v1794_v40 = vld [vmem:[#allocation4 + $0x30] ss:$8 sps:$4 sm:$0xff]   ;;  %v1571_v43 = vcombine.high %v73_v38, %v77_v39  ;;  %v1801_v45 = vld [vmem:[#allocation4 + $0x14] ss:$8 sps:$4 sm:$0xff]   ;;  %v1570_v46 = vcombine.low %v73_v38, %v77_v39  ;;  %v1787_v51 = vld [vmem:[#allocation4 + $0x164] ss:$8 sps:$4 sm:$0xff]  }
  0x33   :  { %1198 = vmatpush1.bf16.msra.mxu0 %v1782_v28  ;;  %v1781_v47 = vld [vmem:[#allocation4 + $0x174] ss:$8 sps:$4 sm:$0xff]   ;;  %v1806_v48 = vld [vmem:[#allocation4 + $0x10] ss:$8 sps:$4 sm:$0xff]   ;;  %v1812_v52 = vld [vmem:[#allocation4] ss:$8 sps:$4 sm:$0xff]  }
  0x34   :  { %1580 = vmatmul.mubr.msk.bf16.vlgmr.msra.gmra.mxu1 %vm213_vm0, %v2106_v11  ;;  %1199 = vmatprep.subr.bf16.mxu0 %v1783_v29  ;;  %v1779_v50 = vld [vmem:[#allocation4 + $0x170] ss:$8 sps:$4 sm:$0xff]   ;;  %v1813_v53 = vld [vmem:[#allocation4 + $0xf4] ss:$8 sps:$4 sm:$0xff]   ;;  %v1785_v54 = vld [vmem:[#allocation4 + $0x160] ss:$8 sps:$4 sm:$0xff]  }
  0x35   :  { %273 = vmatpush1.bf16.msra.mxu1 %v1574_v17  ;;  %292 = vmatprep.mubr.bf16.mxu1 %v2052_v0  ;;  %v1793_v55 = vld [vmem:[#allocation4 + $0x154] ss:$8 sps:$4 sm:$0xff]   ;;  %v1791_v56 = vld [vmem:[#allocation4 + $0x150] ss:$8 sps:$4 sm:$0xff]   ;;  %v1819_v58 = vld [vmem:[#allocation4 + $0xe4] ss:$8 sps:$4 sm:$0xff]  }
  0x36   :  { %274 = vmatprep.subr.bf16.mxu1 %v1567_v20  ;;  %v1818_v57 = vld [vmem:[#allocation4 + $0xf0] ss:$8 sps:$4 sm:$0xff]   ;;  %v1799_v59 = vld [vmem:[#allocation4 + $0x144] ss:$8 sps:$4 sm:$0xff]   ;;  %v1824_v60 = vld [vmem:[#allocation4 + $0xe0] ss:$8 sps:$4 sm:$0xff]  }
  0x37   :  { %1200 = vmatpush1.bf16.msra.mxu0 %v1788_v34  ;;  %v1825_v61 = vld [vmem:[#allocation4 + $0xd4] ss:$8 sps:$4 sm:$0xff]   ;;  %v1797_v62 = vld [vmem:[#allocation4 + $0x140] ss:$8 sps:$4 sm:$0xff]   ;;  %v1831_v1 = vld [vmem:[#allocation4 + $0xc4] ss:$8 sps:$4 sm:$0xff]  }
  0x38   :  { %1201 = vmatprep.subr.bf16.mxu0 %v1789_v35  ;;  %v1805_v63 = vld [vmem:[#allocation4 + $0x134] ss:$8 sps:$4 sm:$0xff]   ;;  %v1803_v2 = vld [vmem:[#allocation4 + $0x130] ss:$8 sps:$4 sm:$0xff]   ;;  %v1811_v3 = vld [vmem:[#allocation4 + $0x124] ss:$8 sps:$4 sm:$0xff]  }
  0x39   :  { %275 = vmatpush1.bf16.msra.mxu1 %v1566_v24  ;;  %v1836_v4 = vld [vmem:[#allocation4 + $0xc0] ss:$8 sps:$4 sm:$0xff]   ;;  %v1837_v5 = vld [vmem:[#allocation4 + $0xb4] ss:$8 sps:$4 sm:$0xff]   ;;  %v1842_v8 = vld [vmem:[#allocation4 + $0xb0] ss:$8 sps:$4 sm:$0xff]  }
  0x3a   :  { %315 = vmatprep.subr.bf16.mxu1 %v1577_v25  ;;  %v1809_v6 = vld [vmem:[#allocation4 + $0x120] ss:$8 sps:$4 sm:$0xff]   ;;  %v1817_v7 = vld [vmem:[#allocation4 + $0x114] ss:$8 sps:$4 sm:$0xff]   ;;  %v1815_v9 = vld [vmem:[#allocation4 + $0x110] ss:$8 sps:$4 sm:$0xff]  }
  0x3b   :  { %1202 = vmatpush1.bf16.msra.mxu0 %v1794_v40  ;;  %v1823_v10 = vld [vmem:[#allocation4 + $0x104] ss:$8 sps:$4 sm:$0xff]   ;;  %v1829_v12 = vld [vmem:[#allocation4 + $0x1f4] ss:$8 sps:$4 sm:$0xff]   ;;  %v1827_v13 = vld [vmem:[#allocation4 + $0x1f0] ss:$8 sps:$4 sm:$0xff]  }
  0x3c   :  { %1581 = vmatmul.mubr.msk.bf16.vlgmr.msra.gmra.mxu1 %vm213_vm0, %v2106_v11  ;;  %1203 = vmatprep.subr.bf16.mxu0 %v1795_v41  ;;  %v1835_v14 = vld [vmem:[#allocation4 + $0x1e4] ss:$8 sps:$4 sm:$0xff]   ;;  %v1833_v15 = vld [vmem:[#allocation4 + $0x1e0] ss:$8 sps:$4 sm:$0xff]   ;;  %v1841_v16 = vld [vmem:[#allocation4 + $0x1d4] ss:$8 sps:$4 sm:$0xff]  }
  0x3d   :  { %316 = vmatpush1.bf16.msra.mxu1 %v1576_v30  ;;  %335 = vmatprep.mubr.bf16.mxu1 %v2052_v0  ;;  %v1839_v17 = vld [vmem:[#allocation4 + $0x1d0] ss:$8 sps:$4 sm:$0xff]   ;;  %v1843_v18 = vld [vmem:[#allocation4 + $0xa4] ss:$8 sps:$4 sm:$0xff]   ;;  %v1845_v20 = vld [vmem:[#allocation4 + $0x1c0] ss:$8 sps:$4 sm:$0xff]  }
  0x3e   :  { %317 = vmatprep.subr.bf16.mxu1 %v1569_v32  ;;  %v1847_v19 = vld [vmem:[#allocation4 + $0x1c4] ss:$8 sps:$4 sm:$0xff]   ;;  %v1848_v21 = vld [vmem:[#allocation4 + $0xa0] ss:$8 sps:$4 sm:$0xff]   ;;  %v1849_v22 = vld [vmem:[#allocation4 + $0x94] ss:$8 sps:$4 sm:$0xff]  }
  0x3f   :  { %1204 = vmatpush1.bf16.msra.mxu0 %v1800_v44  ;;  %v1853_v23 = vld [vmem:[#allocation4 + $0x1b4] ss:$8 sps:$4 sm:$0xff]   ;;  %v1854_v24 = vld [vmem:[#allocation4 + $0x90] ss:$8 sps:$4 sm:$0xff]   ;;  %v1855_v26 = vld [vmem:[#allocation4 + $0x84] ss:$8 sps:$4 sm:$0xff]  }
  0x40   :  { %1205 = vmatprep.subr.bf16.mxu0 %v1801_v45  ;;  %v1851_v25 = vld [vmem:[#allocation4 + $0x1b0] ss:$8 sps:$4 sm:$0xff]   ;;  %v1859_v27 = vld [vmem:[#allocation4 + $0x1a4] ss:$8 sps:$4 sm:$0xff]   ;;  %v1860_v28 = vld [vmem:[#allocation4 + $0x80] ss:$8 sps:$4 sm:$0xff]  }
  0x41   :  { %318 = vmatpush1.bf16.msra.mxu1 %v1568_v36  ;;  %v1857_v29 = vld [vmem:[#allocation4 + $0x1a0] ss:$8 sps:$4 sm:$0xff]   ;;  %v1863_v30 = vld [vmem:[#allocation4 + $0x194] ss:$8 sps:$4 sm:$0xff]   ;;  %v1861_v32 = vld [vmem:[#allocation4 + $0x190] ss:$8 sps:$4 sm:$0xff]   ;;  %v88_v36 = vlaneseq }
  0x42   :  { %358 = vmatprep.subr.bf16.mxu1 %v1579_v37  ;;  %v1866_v31 = vld [vmem:[#allocation4 + $0x274] ss:$8 sps:$4 sm:$0xff]   ;;  %v1869_v33 = vld [vmem:[#allocation4 + $0x184] ss:$8 sps:$4 sm:$0xff]   ;;  %v1867_v34 = vld [vmem:[#allocation4 + $0x180] ss:$8 sps:$4 sm:$0xff]  }
  0x43   :  { %1206 = vmatpush1.bf16.msra.mxu0 %v1806_v48  ;;  %v1878_v35 = vld [vmem:[#allocation4 + $0x374] ss:$8 sps:$4 sm:$0xff]   ;;  %v2119_v37 = vshrl.u32 %v88_v36, 7  ;;  %v2126_v40 = vld [vmem:[%s2173_s2] sm:$0xff] }
  0x44   :  { %1582 = vmatmul.mubr.msk.bf16.vlgmr.msra.gmra.mxu1 %vm213_vm0, %v2106_v11  ;;  %1207 = vmatprep.subr.bf16.mxu0 %v1807_v49 }
  0x45   :  { %359 = vmatpush1.bf16.msra.mxu1 %v1578_v42  ;;  %378 = vmatprep.mubr.bf16.mxu1 %v2052_v0  ;;  %v1830_v0 = vld [vmem:[#allocation4 + $0xd0] ss:$8 sps:$4 sm:$0xff]   ;;  %v94_v38 = vsub.s32 1, %v2119_v37  ;;  %v90_v39 = vsub.s32 0, %v2119_v37  ;;  %v102_v48 = vsub.s32 3, %v2119_v37 }
  0x46   :  { %360 = vmatprep.subr.bf16.mxu1 %v1571_v43 }
  0x47   :  { %1208 = vmatpush1.bf16.msra.mxu0 %v1812_v52  ;;  %v95_v42 = vrot.slane %v2126_v40, %v94_v38  ;;  %v91_v43 = vrot.slane %v2126_v40, %v90_v39 }
  0x48   :  { %1209 = vmatprep.subr.bf16.mxu0 %v1813_v53 }
  0x49   :  { %361 = vmatpush1.bf16.msra.mxu1 %v1570_v46 }
  0x4a   :  { %1236 = vmatprep.subr.bf16.mxu1 %v1781_v47 }
  0x4b   :  { %1210 = vmatpush2.bf16.msra.mxu0 %v1818_v57  ;;  %v103_v57 = vrot.slane %v2126_v40, %v102_v48 }
  0x4c   :  { %1583 = vmatmul.mubr.msk.bf16.vlgmr.msra.gmra.mxu1 %vm213_vm0, %v2106_v11  ;;  %1211 = vmatprep.subr.bf16.mxu0 %v1819_v58  ;;  %v1821_v11 = vld [vmem:[#allocation4 + $0x100] ss:$8 sps:$4 sm:$0xff]  }
  0x4d   :  { %1237 = vmatpush1.bf16.msra.mxu1 %v1779_v50 }
  0x4e   :  { %1238 = vmatprep.subr.bf16.mxu1 %v1787_v51  ;;  %v98_v51 = vsub.s32 2, %v2119_v37 }
  0x4f   :  { %1212 = vmatpush2.bf16.msra.mxu0 %v1824_v60 }
  0x50   :  { %1213 = vmatprep.subr.bf16.mxu0 %v1825_v61 }
  0x51   :  { %1239 = vmatpush1.bf16.msra.mxu1 %v1785_v54 }
  0x52   :  { %1240 = vmatprep.subr.bf16.mxu1 %v1793_v55 }
  0x53   :  { %1214 = vmatpush2.bf16.msra.mxu0 %v1830_v0 }
  0x54   :  { %1215 = vmatprep.subr.bf16.mxu0 %v1831_v1 }
  0x55   :  { %1241 = vmatpush1.bf16.msra.mxu1 %v1791_v56 }
  0x56   :  { %1242 = vmatprep.subr.bf16.mxu1 %v1799_v59  ;;  %v99_v59 = vrot.slane %v2126_v40, %v98_v51 }
  0x57   :  { %1216 = vmatpush2.bf16.msra.mxu0 %v1836_v4 }
  0x58   :  { %1217 = vmatprep.subr.bf16.mxu0 %v1837_v5 }
  0x59   :  { %1243 = vmatpush1.bf16.msra.mxu1 %v1797_v62  ;;  %v1864_v62 = vld [vmem:[#allocation4 + $0x270] ss:$8 sps:$4 sm:$0xff]  }
  0x5a   :  { %1244 = vmatprep.subr.bf16.mxu1 %v1805_v63  ;;  %v110_v63 = vsub.s32 5, %v2119_v37 }
  0x5b   :  { %1218 = vmatpush2.bf16.msra.mxu0 %v1842_v8  ;;  %v1870_v8 = vld [vmem:[#allocation4 + $0x260] ss:$8 sps:$4 sm:$0xff]  }
  0x5c   :  { %1219 = vmatprep.subr.bf16.mxu0 %v1843_v18  ;;  %v1873_v18 = vld [vmem:[#allocation4 + $0x250] ss:$8 sps:$4 sm:$0xff]  }
  0x5d   :  { %1245 = vmatpush1.bf16.msra.mxu1 %v1803_v2  ;;  %v1872_v2 = vld [vmem:[#allocation4 + $0x264] ss:$8 sps:$4 sm:$0xff]  }
  0x5e   :  { %1246 = vmatprep.subr.bf16.mxu1 %v1811_v3 }
  0x5f   :  { %1220 = vmatpush2.bf16.msra.mxu0 %v1848_v21  ;;  %v118_v21 = vsub.s32 7, %v2119_v37 }
  0x60   :  { %1221 = vmatprep.subr.bf16.mxu0 %v1849_v22 }
  0x61   :  { %1247 = vmatpush1.bf16.msra.mxu1 %v1809_v6 }
  0x62   :  { %1248 = vmatprep.subr.bf16.mxu1 %v1817_v7 }
  0x63   :  { %1222 = vmatpush2.bf16.msra.mxu0 %v1854_v24  ;;  %v1884_v24 = vld [vmem:[#allocation4 + $0x364] ss:$8 sps:$4 sm:$0xff]  }
  0x64   :  { %1223 = vmatprep.subr.bf16.mxu0 %v1855_v26 }
  0x65   :  { %1249 = vmatpush1.bf16.msra.mxu1 %v1815_v9  ;;  %v111_v9 = vrot.slane %v2126_v40, %v110_v63  ;;  %v1911_v63 = vld [vmem:[#allocation4 + $0x2f4] ss:$8 sps:$4 sm:$0xff]  }
  0x66   :  { %1250 = vmatprep.subr.bf16.mxu1 %v1823_v10 }
  0x67   :  { %1224 = vmatpush2.bf16.msra.mxu0 %v1860_v28  ;;  %v1882_v28 = vld [vmem:[#allocation4 + $0x360] ss:$8 sps:$4 sm:$0xff]  }
  0x68   :  { %1279 = vmatprep.subr.bf16.mxu0 %v1866_v31  ;;  %v119_v31 = vrot.slane %v2126_v40, %v118_v21  ;;  %v1941_v21 = vld [vmem:[#allocation4 + $0x2a4] ss:$8 sps:$4 sm:$0xff]  }
  0x69   :  { %1251 = vmatpush1.bf16.msra.mxu1 %v1821_v11  ;;  %v1875_v11 = vld [vmem:[#allocation4 + $0x254] ss:$8 sps:$4 sm:$0xff]  }
  0x6a   :  { %1252 = vmatprep.subr.bf16.mxu1 %v1829_v12 }
  0x6d   :  { %1253 = vmatpush2.bf16.msra.mxu1 %v1827_v13 }
  0x6e   :  { %1254 = vmatprep.subr.bf16.mxu1 %v1835_v14 }
  0x71   :  { %1255 = vmatpush2.bf16.msra.mxu1 %v1833_v15 }
  0x72   :  { %1256 = vmatprep.subr.bf16.mxu1 %v1841_v16 }
  0x75   :  { %1257 = vmatpush2.bf16.msra.mxu1 %v1839_v17 }
  0x76   :  { %1258 = vmatprep.subr.bf16.mxu1 %v1847_v19  ;;  %v1876_v19 = vld [vmem:[#allocation4 + $0x370] ss:$8 sps:$4 sm:$0xff]  }
  0x79   :  { %1259 = vmatpush2.bf16.msra.mxu1 %v1845_v20 }
  0x7a   :  { %1260 = vmatprep.subr.bf16.mxu1 %v1853_v23  ;;  %v1881_v23 = vld [vmem:[#allocation4 + $0x244] ss:$8 sps:$4 sm:$0xff]  }
  0x7d   :  { %1261 = vmatpush2.bf16.msra.mxu1 %v1851_v25 }
  0x7e   :  { %1262 = vmatprep.subr.bf16.mxu1 %v1859_v27  ;;  %v1879_v27 = vld [vmem:[#allocation4 + $0x240] ss:$8 sps:$4 sm:$0xff]  }
  0x81   :  { %1263 = vmatpush2.bf16.msra.mxu1 %v1857_v29 }
  0x82   :  { %1264 = vmatprep.subr.bf16.mxu1 %v1863_v30 }
  0x85   :  { %1265 = vmatpush2.bf16.msra.mxu1 %v1861_v32  ;;  %v1887_v32 = vld [vmem:[#allocation4 + $0x234] ss:$8 sps:$4 sm:$0xff]  }
  0x86   :  { %1266 = vmatprep.subr.bf16.mxu1 %v1869_v33  ;;  %v1890_v33 = vld [vmem:[#allocation4 + $0x354] ss:$8 sps:$4 sm:$0xff]  }
  0x89   :  { %1267 = vmatpush2.bf16.msra.mxu1 %v1867_v34 }
  0x8a   :  { %1322 = vmatprep.subr.bf16.mxu1 %v1878_v35 }
  0xf4   :  { %v251_v41 = vpop.f32.mrf.mxu1 }
  0xf5   :  { %v252_v49 = vadd.f32 %v251_v41, %v91_v43  ;;  %v1885_v41 = vld [vmem:[#allocation4 + $0x230] ss:$8 sps:$4 sm:$0xff]  }
  0xf6   :  { %v253_v44 = vpop.f32.mrf.mxu1 }
  0xf7   :  { %v254_v46 = vadd.f32 %v253_v44, %v95_v42  ;;  %v389_v58 = vmax.f32 %v252_v49, 0.0  ;;  %v1891_v49 = vld [vmem:[#allocation4 + $0x220] ss:$8 sps:$4 sm:$0xff]  }
  0xf8   :  { %v255_v45 = vpop.f32.mrf.mxu1 }
  0xf9   :  { %v256_v47 = vadd.f32 %v255_v45, %v91_v43  ;;  %v390_v55 = vmax.f32 %v254_v46, 0.0  ;;  %v1893_v45 = vld [vmem:[#allocation4 + $0x224] ss:$8 sps:$4 sm:$0xff]  }
  0xfa   :  { %v257_v50 = vpop.f32.mrf.mxu1  ;;  %v1896_v46 = vld [vmem:[#allocation4 + $0x344] ss:$8 sps:$4 sm:$0xff]  }
  0xfb   :  { %v258_v52 = vadd.f32 %v257_v50, %v95_v42  ;;  %v397_v53 = vmax.f32 %v256_v47, 0.0  ;;  %v1888_v42 = vld [vmem:[#allocation4 + $0x350] ss:$8 sps:$4 sm:$0xff]   ;;  %v1894_v50 = vld [vmem:[#allocation4 + $0x340] ss:$8 sps:$4 sm:$0xff]  }
  0xfc   :  { %v294_v54 = vpop.f32.mrf.mxu1 }
  0xfd   :  { %v398_v56 = vmax.f32 %v258_v52, 0.0  ;;  %v405_v0 = vpack.c.bf16 %v397_v53, %v389_v58  ;;  %v295_v5 = vadd.f32 %v294_v54, %v99_v59  ;;  %v1899_v53 = vld [vmem:[#allocation4 + $0x214] ss:$8 sps:$4 sm:$0xff]  }
  0xfe   :  { %v296_v60 = vpop.f32.mrf.mxu1  ;;  %v1902_v54 = vld [vmem:[#allocation4 + $0x334] ss:$8 sps:$4 sm:$0xff]  }
  0xff   :  { %v406_v61 = vpack.c.bf16 %v398_v56, %v390_v55  ;;  %v297_v3 = vadd.f32 %v296_v60, %v103_v57  ;;  %v391_v15 = vmax.f32 %v295_v5, 0.0  ;;  %v1897_v56 = vld [vmem:[#allocation4 + $0x210] ss:$8 sps:$4 sm:$0xff]   ;;  %v1908_v60 = vld [vmem:[#allocation4 + $0x324] ss:$8 sps:$4 sm:$0xff]  }
 0x100   :  { %v298_v1 = vpop.f32.mrf.mxu1  ;;  %v1915_v5 = vld [vmem:[#allocation4 + $0x2e0] ss:$8 sps:$4 sm:$0xff]  }
 0x101   :  { %v299_v4 = vadd.f32 %v298_v1, %v99_v59  ;;  %1225 = vmatprep.mubr.bf16.mxu0 %v406_v61  ;;  %v392_v13 = vmax.f32 %v297_v3, 0.0  ;;  %v1905_v59 = vld [vmem:[#allocation4 + $0x204] ss:$8 sps:$4 sm:$0xff]   ;;  %v1903_v61 = vld [vmem:[#allocation4 + $0x200] ss:$8 sps:$4 sm:$0xff]  }
 0x102   :  { %v300_v6 = vpop.f32.mrf.mxu1  ;;  %1226 = vmatmul.mubr.bf16.vlgmr.msra.gmra.mxu0 %v405_v0  ;;  %v1914_v0 = vld [vmem:[#allocation4 + $0x314] ss:$8 sps:$4 sm:$0xff]   ;;  %v1909_v1 = vld [vmem:[#allocation4 + $0x2f0] ss:$8 sps:$4 sm:$0xff]   ;;  %v1917_v3 = vld [vmem:[#allocation4 + $0x2e4] ss:$8 sps:$4 sm:$0xff]  }
 0x103   :  { %v301_v7 = vadd.f32 %v300_v6, %v103_v57  ;;  %1280 = vmatpush1.bf16.msra.mxu0 %v1864_v62  ;;  %v399_v10 = vmax.f32 %v299_v4, 0.0  ;;  %v1900_v57 = vld [vmem:[#allocation4 + $0x330] ss:$8 sps:$4 sm:$0xff]   ;;  %v1906_v62 = vld [vmem:[#allocation4 + $0x320] ss:$8 sps:$4 sm:$0xff]  }
 0x104   :  { %1281 = vmatprep.subr.bf16.mxu0 %v1872_v2  ;;  %v2140_v12 = vpop.f32.mrf.mxu1  ;;  %v1912_v2 = vld [vmem:[#allocation4 + $0x310] ss:$8 sps:$4 sm:$0xff]   ;;  %v1920_v4 = vld [vmem:[#allocation4 + $0x304] ss:$8 sps:$4 sm:$0xff]   ;;  %v1918_v6 = vld [vmem:[#allocation4 + $0x300] ss:$8 sps:$4 sm:$0xff]  }
 0x105   :  { %v400_v14 = vmax.f32 %v301_v7, 0.0  ;;  %v407_v22 = vpack.c.bf16 %v399_v10, %v391_v15  ;;  %v1923_v7 = vld [vmem:[#allocation4 + $0x2d4] ss:$8 sps:$4 sm:$0xff]   ;;  %v1924_v10 = vld [vmem:[#allocation4 + $0x3f0] ss:$8 sps:$4 sm:$0xff]  }
 0x106   :  { %v339_v16 = vpop.f32.mrf.mxu1  ;;  %v1930_v15 = vld [vmem:[#allocation4 + $0x3e0] ss:$8 sps:$4 sm:$0xff]  }
 0x107   :  { %v408_v17 = vpack.c.bf16 %v400_v14, %v392_v13  ;;  %1282 = vmatpush1.bf16.msra.mxu0 %v1870_v8  ;;  %v340_v20 = vadd.f32 %v339_v16, %v111_v9  ;;  %v1926_v8 = vld [vmem:[#allocation4 + $0x3f4] ss:$8 sps:$4 sm:$0xff]   ;;  %v1932_v13 = vld [vmem:[#allocation4 + $0x3e4] ss:$8 sps:$4 sm:$0xff]   ;;  %v1927_v14 = vld [vmem:[#allocation4 + $0x2c0] ss:$8 sps:$4 sm:$0xff]  }
 0x108   :  { %1283 = vmatprep.subr.bf16.mxu0 %v1875_v11  ;;  %v2143_v25 = vpop.f32.mrf.mxu1  ;;  %v1929_v11 = vld [vmem:[#allocation4 + $0x2c4] ss:$8 sps:$4 sm:$0xff]   ;;  %v1935_v16 = vld [vmem:[#allocation4 + $0x2b4] ss:$8 sps:$4 sm:$0xff]  }
 0x109   :  { %1268 = vmatprep.mubr.bf16.mxu1 %v408_v17  ;;  %v394_v29 = vmax.f32 %v340_v20, 0.0  ;;  %v1938_v17 = vld [vmem:[#allocation4 + $0x3d4] ss:$8 sps:$4 sm:$0xff]   ;;  %v106_v20 = vsub.s32 4, %v2119_v37 }
 0x10a   :  { %1269 = vmatmul.mubr.bf16.vlgmr.msra.gmra.mxu1 %v407_v22  ;;  %v343_v26 = vpop.f32.mrf.mxu1  ;;  %v1944_v22 = vld [vmem:[#allocation4 + $0x3c4] ss:$8 sps:$4 sm:$0xff]  }
 0x10b   :  { %1284 = vmatpush1.bf16.msra.mxu0 %v1873_v18  ;;  %1323 = vmatpush1.bf16.msra.mxu1 %v1876_v19  ;;  %v344_v30 = vadd.f32 %v343_v26, %v111_v9  ;;  %v1921_v9 = vld [vmem:[#allocation4 + $0x2d0] ss:$8 sps:$4 sm:$0xff]   ;;  %v107_v26 = vrot.slane %v2126_v40, %v106_v20 }
 0x10c   :  { %1285 = vmatprep.subr.bf16.mxu0 %v1881_v23  ;;  %1324 = vmatprep.subr.bf16.mxu1 %v1884_v24  ;;  %v2146_v34 = vpop.f32.mrf.mxu1  ;;  %v1933_v18 = vld [vmem:[#allocation4 + $0x2b0] ss:$8 sps:$4 sm:$0xff]   ;;  %v1939_v23 = vld [vmem:[#allocation4 + $0x2a0] ss:$8 sps:$4 sm:$0xff]  }
 0x10d   :  { %v402_v35 = vmax.f32 %v344_v30, 0.0  ;;  %v1936_v19 = vld [vmem:[#allocation4 + $0x3d0] ss:$8 sps:$4 sm:$0xff]   ;;  %v1942_v24 = vld [vmem:[#allocation4 + $0x3c0] ss:$8 sps:$4 sm:$0xff]  }
 0x10e   :  { %v382_v36 = vpop.f32.mrf.mxu1  ;;  %v1948_v30 = vld [vmem:[#allocation4 + $0x3b0] ss:$8 sps:$4 sm:$0xff]  }
 0x10f   :  { %1286 = vmatpush1.bf16.msra.mxu0 %v1879_v27  ;;  %1325 = vmatpush1.bf16.msra.mxu1 %v1882_v28  ;;  %v410_v43 = vpack.c.bf16 %v402_v35, %v394_v29  ;;  %v383_v44 = vadd.f32 %v382_v36, %v119_v31  ;;  %v1947_v27 = vld [vmem:[#allocation4 + $0x294] ss:$8 sps:$4 sm:$0xff]   ;;  %v1945_v29 = vld [vmem:[#allocation4 + $0x290] ss:$8 sps:$4 sm:$0xff]   ;;  %v1953_v35 = vld [vmem:[#allocation4 + $0x284] ss:$8 sps:$4 sm:$0xff]  }
 0x110   :  { %1287 = vmatprep.subr.bf16.mxu0 %v1887_v32  ;;  %1326 = vmatprep.subr.bf16.mxu1 %v1890_v33  ;;  %v2148_v47 = vpop.f32.mrf.mxu1  ;;  %v1950_v28 = vld [vmem:[#allocation4 + $0x3b4] ss:$8 sps:$4 sm:$0xff]   ;;  %v342_v32 = vadd.f32 %v2143_v25, %v107_v26  ;;  %v114_v33 = vsub.s32 6, %v2119_v37  ;;  %v1956_v36 = vld [vmem:[#allocation4 + $0x3a4] ss:$8 sps:$4 sm:$0xff]  }
 0x111   :  { %1311 = vmatprep.mubr.bf16.mxu0 %v410_v43  ;;  %v396_v51 = vmax.f32 %v383_v44, 0.0 }
 0x112   :  { %v386_v48 = vpop.f32.mrf.mxu1  ;;  %v401_v44 = vmax.f32 %v342_v32, 0.0 }
 0x113   :  { %1288 = vmatpush1.bf16.msra.mxu0 %v1885_v41  ;;  %1327 = vmatpush1.bf16.msra.mxu1 %v1888_v42  ;;  %v387_v52 = vadd.f32 %v386_v48, %v119_v31  ;;  %v338_v31 = vadd.f32 %v2140_v12, %v107_v26  ;;  %v1951_v41 = vld [vmem:[#allocation4 + $0x280] ss:$8 sps:$4 sm:$0xff]   ;;  %v1957_v12 = vld [vmem:[#allocation4 + $0x390] ss:$8 sps:$4 sm:$0xff]  }
 0x114   :  { %1289 = vmatprep.subr.bf16.mxu0 %v1893_v45  ;;  %1328 = vmatprep.subr.bf16.mxu1 %v1896_v46  ;;  %v1954_v42 = vld [vmem:[#allocation4 + $0x3a0] ss:$8 sps:$4 sm:$0xff]   ;;  %v115_v45 = vrot.slane %v2126_v40, %v114_v33  ;;  %v1959_v46 = vld [vmem:[#allocation4 + $0x394] ss:$8 sps:$4 sm:$0xff]  }
 0x115   :  { %v404_v55 = vmax.f32 %v387_v52, 0.0  ;;  %v393_v43 = vmax.f32 %v338_v31, 0.0 }
 0x116   :  { %v381_v48 = vadd.f32 %v2146_v34, %v115_v45  ;;  %v1967_v34 = vld [vmem:[#allocation6 + $0x68] sm:$0xff]  }
 0x117   :  { %1290 = vmatpush1.bf16.msra.mxu0 %v1891_v49  ;;  %1329 = vmatpush1.bf16.msra.mxu1 %v1894_v50  ;;  %v412_v58 = vpack.c.bf16 %v404_v55, %v396_v51  ;;  %v409_v25 = vpack.c.bf16 %v401_v44, %v393_v43  ;;  %v385_v49 = vadd.f32 %v2148_v47, %v115_v45  ;;  %v1962_v50 = vld [vmem:[#allocation4 + $0x384] ss:$8 sps:$4 sm:$0xff]   ;;  %v1960_v51 = vld [vmem:[#allocation4 + $0x380] ss:$8 sps:$4 sm:$0xff]   ;;  %v1964_v55 = vld [vmem:[#allocation6 + $0x38] sm:$0xff]  }
 0x118   :  { %1291 = vmatprep.subr.bf16.mxu0 %v1899_v53  ;;  %1330 = vmatprep.subr.bf16.mxu1 %v1902_v54  ;;  %v395_v52 = vmax.f32 %v381_v48, 0.0  ;;  %v1963_v54 = vld [vmem:[#allocation6 + $0x78] sm:$0xff]   ;;  %v1968_v47 = vld [vmem:[#allocation6 + $0x28] sm:$0xff]  }
 0x119   :  { %1354 = vmatprep.mubr.bf16.mxu1 %v412_v58  ;;  %v403_v53 = vmax.f32 %v385_v49, 0.0  ;;  %v1969_v58 = vld [vmem:[#allocation6 + $0x60] sm:$0xff]  }
 0x11b   :  { %1292 = vmatpush1.bf16.msra.mxu0 %v1897_v56  ;;  %1331 = vmatpush1.bf16.msra.mxu1 %v1900_v57  ;;  %v411_v40 = vpack.c.bf16 %v403_v53, %v395_v52  ;;  %v1965_v56 = vld [vmem:[#allocation6 + $0x70] sm:$0xff]   ;;  %v1712_v52 = vld [vmem:[%s2177_s6] ss:$0 sm:$0xff] }
 0x11c   :  { %1293 = vmatprep.subr.bf16.mxu0 %v1905_v59  ;;  %1332 = vmatprep.subr.bf16.mxu1 %v1908_v60  ;;  %v1966_v57 = vld [vmem:[#allocation6 + $0x30] sm:$0xff]   ;;  %v1970_v59 = vld [vmem:[#allocation6 + $0x20] sm:$0xff]   ;;  %v1971_v60 = vld [vmem:[#allocation6 + $0x58] sm:$0xff]  }
 0x11f   :  { %1294 = vmatpush1.bf16.msra.mxu0 %v1903_v61  ;;  %1333 = vmatpush1.bf16.msra.mxu1 %v1906_v62  ;;  %v1972_v61 = vld [vmem:[#allocation6 + $0x18] sm:$0xff]   ;;  %v1973_v62 = vld [vmem:[#allocation6 + $0x50] sm:$0xff]  }
 0x120   :  { %1295 = vmatprep.subr.bf16.mxu0 %v1911_v63  ;;  %1334 = vmatprep.subr.bf16.mxu1 %v1914_v0  ;;  %v1974_v63 = vld [vmem:[#allocation6 + $0x10] sm:$0xff]   ;;  %v1975_v0 = vld [vmem:[#allocation6 + $0x48] sm:$0xff]  }
 0x123   :  { %1296 = vmatpush2.bf16.msra.mxu0 %v1909_v1  ;;  %1335 = vmatpush1.bf16.msra.mxu1 %v1912_v2  ;;  %v1976_v1 = vld [vmem:[#allocation6 + $0x8] sm:$0xff]   ;;  %v1977_v2 = vld [vmem:[#allocation6 + $0x40] sm:$0xff]  }
 0x124   :  { %1297 = vmatprep.subr.bf16.mxu0 %v1917_v3  ;;  %1336 = vmatprep.subr.bf16.mxu1 %v1920_v4  ;;  %v1978_v3 = vld [vmem:[#allocation6] sm:$0xff]  }
 0x127   :  { %1298 = vmatpush2.bf16.msra.mxu0 %v1915_v5  ;;  %1337 = vmatpush1.bf16.msra.mxu1 %v1918_v6 }
 0x128   :  { %1299 = vmatprep.subr.bf16.mxu0 %v1923_v7  ;;  %1338 = vmatprep.subr.bf16.mxu1 %v1926_v8 }
 0x12b   :  { %1300 = vmatpush2.bf16.msra.mxu0 %v1921_v9  ;;  %1339 = vmatpush2.bf16.msra.mxu1 %v1924_v10 }
 0x12c   :  { %1301 = vmatprep.subr.bf16.mxu0 %v1929_v11  ;;  %1340 = vmatprep.subr.bf16.mxu1 %v1932_v13  ;;  %v541_v11 = vld [vmem:[%s2175_s4] sm:$0x3] }
 0x12f   :  { %1302 = vmatpush2.bf16.msra.mxu0 %v1927_v14  ;;  %1341 = vmatpush2.bf16.msra.mxu1 %v1930_v15  ;;  %v550_v15 = vrot.slane %v541_v11, %v94_v38 }
 0x130   :  { %1303 = vmatprep.subr.bf16.mxu0 %v1935_v16  ;;  %1342 = vmatprep.subr.bf16.mxu1 %v1938_v17  ;;  %v546_v16 = vrot.slane %v541_v11, %v90_v39 }
 0x133   :  { %1304 = vmatpush2.bf16.msra.mxu0 %v1933_v18  ;;  %1343 = vmatpush2.bf16.msra.mxu1 %v1936_v19 }
 0x134   :  { %1305 = vmatprep.subr.bf16.mxu0 %v1941_v21  ;;  %1344 = vmatprep.subr.bf16.mxu1 %v1944_v22 }
 0x137   :  { %1306 = vmatpush2.bf16.msra.mxu0 %v1939_v23  ;;  %1345 = vmatpush2.bf16.msra.mxu1 %v1942_v24 }
 0x138   :  { %1307 = vmatprep.subr.bf16.mxu0 %v1947_v27  ;;  %1346 = vmatprep.subr.bf16.mxu1 %v1950_v28 }
 0x13b   :  { %1308 = vmatpush2.bf16.msra.mxu0 %v1945_v29  ;;  %1347 = vmatpush2.bf16.msra.mxu1 %v1948_v30 }
 0x13c   :  { %1309 = vmatprep.subr.bf16.mxu0 %v1953_v35  ;;  %1348 = vmatprep.subr.bf16.mxu1 %v1956_v36 }
 0x13f   :  { %1310 = vmatpush2.bf16.msra.mxu0 %v1951_v41  ;;  %1349 = vmatpush2.bf16.msra.mxu1 %v1954_v42 }
 0x140   :  { %1350 = vmatprep.subr.bf16.mxu1 %v1959_v46  ;;  %1738 = vmatprep.subr.bf16.mxu0 %v1963_v54 }
 0x142   :  { %1312 = vmatmul.mubr.bf16.vlgmr.msra.gmra.mxu0 %v409_v25 }
 0x143   :  { %1351 = vmatpush2.bf16.msra.mxu1 %v1957_v12  ;;  %1739 = vmatpush3.bf16.msra.mxu0 %v1964_v55 }
 0x144   :  { %1352 = vmatprep.subr.bf16.mxu1 %v1962_v50  ;;  %1740 = vmatprep.subr.bf16.mxu0 %v1965_v56 }
 0x147   :  { %1353 = vmatpush2.bf16.msra.mxu1 %v1960_v51  ;;  %1741 = vmatpush3.bf16.msra.mxu0 %v1966_v57 }
 0x148   :  { %1742 = vmatprep.subr.bf16.mxu0 %v1967_v34 }
 0x14a   :  { %1355 = vmatmul.mubr.bf16.vlgmr.msra.gmra.mxu1 %v411_v40 }
 0x14b   :  { %1743 = vmatpush3.bf16.msra.mxu0 %v1968_v47 }
 0x14c   :  { %1744 = vmatprep.subr.bf16.mxu0 %v1969_v58 }
 0x14f   :  { %1745 = vmatpush3.bf16.msra.mxu0 %v1970_v59 }
 0x150   :  { %1746 = vmatprep.subr.bf16.mxu0 %v1971_v60 }
 0x153   :  { %1747 = vmatpush3.bf16.msra.mxu0 %v1972_v61 }
 0x154   :  { %1748 = vmatprep.subr.bf16.mxu0 %v1973_v62 }
 0x157   :  { %1749 = vmatpush3.bf16.msra.mxu0 %v1974_v63 }
 0x158   :  { %1750 = vmatprep.subr.bf16.mxu0 %v1975_v0 }
 0x15b   :  { %1751 = vmatpush3.bf16.msra.mxu0 %v1976_v1 }
 0x15c   :  { %1752 = vmatprep.subr.bf16.mxu0 %v1977_v2 }
 0x15f   :  { %1753 = vmatpush3.bf16.msra.mxu0 %v1978_v3 }
 0x1c2   :  { %v1227_v4 = vpop.f32.mrf.mxu0 }
 0x1c3   :  { %v1228_v21 = vadd.f32 %v1227_v4, %v546_v16 }
 0x1c4   :  { %v1229_v5 = vpop.f32.mrf.mxu0 }
 0x1c5   :  { %v1230_v19 = vadd.f32 %v1229_v5, %v550_v15 }
 0x1c6   :  { %v1231_v6 = vpop.f32.mrf.mxu0 }
 0x1c7   :  { %v1232_v20 = vadd.f32 %v1231_v6, %v546_v16 }
 0x1c8   :  { %v1233_v8 = vpop.f32.mrf.mxu0 }
 0x1c9   :  { %v1234_v23 = vadd.f32 %v1233_v8, %v550_v15 }
 0x1ca   :  { %v1270_v7 = vpop.f32.mrf.mxu1 }
 0x1cb   :  { %v1271_v27 = vadd.f32 %v1270_v7, %v1228_v21 }
 0x1cc   :  { %v1272_v9 = vpop.f32.mrf.mxu1 }
 0x1cd   :  { %v1273_v24 = vadd.f32 %v1272_v9, %v1230_v19 }
 0x1ce   :  { %v1274_v13 = vpop.f32.mrf.mxu1 }
 0x1cf   :  { %v1275_v26 = vadd.f32 %v1274_v13, %v1232_v20 }
 0x1d0   :  { %v1276_v17 = vpop.f32.mrf.mxu1 }
 0x1d1   :  { %v1277_v30 = vadd.f32 %v1276_v17, %v1234_v23 }
 0x202   :  { %v1313_v10 = vpop.f32.mrf.mxu0 }
 0x203   :  { %v1314_v33 = vadd.f32 %v1313_v10, %v1271_v27 }
 0x204   :  { %v1315_v14 = vpop.f32.mrf.mxu0 }
 0x205   :  { %v1316_v31 = vadd.f32 %v1315_v14, %v1273_v24 }
 0x206   :  { %v1317_v18 = vpop.f32.mrf.mxu0 }
 0x207   :  { %v1318_v32 = vadd.f32 %v1317_v18, %v1275_v26 }
 0x208   :  { %v1319_v28 = vpop.f32.mrf.mxu0 }
 0x209   :  { %v1320_v35 = vadd.f32 %v1319_v28, %v1277_v30 }
 0x20a   :  { %v1356_v22 = vpop.f32.mrf.mxu1 }
 0x20b   :  { %v1357_v36 = vadd.f32 %v1356_v22, %v1314_v33 }
 0x20c   :  { %v1358_v29 = vpop.f32.mrf.mxu1 }
 0x20d   :  { %v1359_v37 = vadd.f32 %v1358_v29, %v1316_v31  ;;  %v1365_v46 = vmax.f32 %v1357_v36, 0.0 }
 0x20e   :  { %v1360_v38 = vpop.f32.mrf.mxu1 }
 0x20f   :  { %v1361_v39 = vadd.f32 %v1360_v38, %v1318_v32  ;;  %v1366_v44 = vmax.f32 %v1359_v37, 0.0 }
 0x210   :  { %v1362_v41 = vpop.f32.mrf.mxu1 }
 0x211   :  { %v1363_v42 = vadd.f32 %v1362_v41, %v1320_v35  ;;  %v1367_v43 = vmax.f32 %v1361_v39, 0.0 }
 0x213   :  { %v1368_v45 = vmax.f32 %v1363_v42, 0.0  ;;  %v1369_v25 = vpack.c.bf16 %v1367_v43, %v1365_v46 }
 0x215   :  { %v1370_v12 = vpack.c.bf16 %v1368_v45, %v1366_v44 }
 0x217   :  { %1538 = vmatprep.mubr.bf16.mxu0 %v1370_v12 }
 0x218   :  { %1539 = vmatmul.mubr.bf16.vlgmr.msra.gmra.mxu0 %v1369_v25 }
 0x2d8   :  { %v1754_v48 = vpop.f32.mrf.mxu0 }
 0x2da   :  { %v1755_v49 = vpop.f32.mrf.mxu0 }
 0x2db   :  { %v1756_v51 = vadd.f32 %v1755_v49, %v1754_v48 }
 0x2dc   :  { %v1757_v50 = vpop.f32.mrf.mxu0 }
 0x2dd   :  { %v1541_v54 = vadd.f32 %v1756_v51, %v1712_v52 }
 0x2de   :  { %v1758_v53 = vpop.f32.mrf.mxu0 }
 0x2df   :  { %v1759_v40 = vadd.f32 %v1758_v53, %v1757_v50 }
 0x2e1   :  { %v1544_v55 = vadd.f32 %v1759_v40, %v1712_v52 }
 0x2e3   :  { %v1736_v56 = vpack.c.bf16 %v1544_v55, %v1541_v54 }
 0x2e5   :  { %1737 = vst [vmem:[%s2178_s7] sm:$0xff] %v1736_v56  }
 0x2e6   :  { %1561 = vsyncpa [#allocation3], 1 }
 0x2e7   :  { %1562 = vsyncpa [#allocation5], 1 }

</bundles_post_ra>
